<compile_context>
chip_gen: v6e
topology: v6e:2x2x1
jax: 0.10.0
libtpu: 0.0.40
codegen_flags: <defaults>
</compile_context>

<pallas_src>
import functools

import jax
import jax.numpy as jnp
from jax import lax
from jax.experimental import pallas as pl
from jax.experimental.pallas import tpu as pltpu

_LANES = 128
_SUBLANES = 8


def _stable_bce(x, y):
    # Numerically-stable BCE with logits (matches torch.nn.BCEWithLogitsLoss):
    #   max(x, 0) - x*y + log1p(exp(-|x|))
    return jnp.maximum(x, 0.0) - x * y + jnp.log1p(jnp.exp(-jnp.abs(x)))


def _bce_sum_kernel(x_ref, y_ref, o_ref, acc_ref, *, total_rows, tile_rows,
                    blocks_per_chunk, multi_chunk, has_partial):
    """Accumulate the stable BCE-with-logits sum for one chunk of tiles."""
    if multi_chunk:
        c = pl.program_id(0)        # chunk axis ("parallel"; one per TC on v7x)
        i = pl.program_id(1)        # streaming reduction axis ("arbitrary")
        n_i = pl.num_programs(1)
    else:
        c = 0
        i = pl.program_id(0)
        n_i = pl.num_programs(0)

    @pl.when(i == 0)
    def _():
        acc_ref[...] = jnp.zeros_like(acc_ref)

    x = x_ref[...].astype(jnp.float32)
    y = y_ref[...].astype(jnp.float32)
    bce = _stable_bce(x, y)

    def _fold(v):
        # (tile_rows, 128) -> (8, 128): VPU adds along the major axis only;
        # no cross-lane/sublane reduce in the hot loop.
        return v.reshape(tile_rows // _SUBLANES, _SUBLANES, _LANES).sum(axis=0)

    g = c * blocks_per_chunk + i              # global (unclamped) block index
    row_start = g * tile_rows

    if has_partial:
        is_full = row_start + tile_rows <= total_rows

        @pl.when(is_full)
        def _():
            acc_ref[...] += _fold(bce)

        @pl.when(jnp.logical_not(is_full))
        def _():
            # Partial last block or a clamped duplicate block (nvalid <= 0):
            # zero out rows past the end.  Row-granular compare => no int32
            # overflow even for multi-billion-element tensors.
            nvalid = total_rows - row_start
            row_idx = lax.broadcasted_iota(jnp.int32, (tile_rows, _LANES), 0)
            acc_ref[...] += _fold(jnp.where(row_idx < nvalid, bce, 0.0))
    else:
        acc_ref[...] += _fold(bce)

    @pl.when(i == n_i - 1)
    def _():
        o_ref[...] = acc_ref[...].reshape(1, _SUBLANES, _LANES)


def _num_chunks_for_device():
    """2 on v7x (two TensorCores per chip), 1 elsewhere (v5e / v6e / other)."""
    try:
        kind = (jax.devices()[0].device_kind or "").lower()
    except Exception:
        return 1
    return 2 if ("v7" in kind or "7x" in kind) else 1


def focal_loss(x, y, *, gamma=0.8, reduction="mean", tile_rows=4096,
               num_chunks=None, binary_targets=True):
    """Focal loss on top of BCEWithLogitsLoss(reduction='mean'), Pallas-backed."""
    assert reduction == "mean", "only reduction='mean' implemented"
    assert x.shape == y.shape
    assert tile_rows % _SUBLANES == 0
    n_elems = x.size

    # Binary {0,1} targets are exact in bf16; streaming them at 2 B/elem cuts
    # HBM traffic ~25% on this bandwidth-bound kernel (the cast fuses with the
    # label producer under a surrounding jit).  Set binary_targets=False for
    # soft labels to keep full f32 precision.
    if binary_targets and jnp.dtype(y.dtype).itemsize > 2:
        y = y.astype(jnp.bfloat16)

    x_flat = x.reshape(-1)
    y_flat = y.reshape(-1)

    rows = n_elems // _LANES                  # lane-aligned rows
    rem = n_elems - rows * _LANES             # 0..127 leftover elements
    if rows < _SUBLANES:
        # Too small for one (8,128) slab: do everything in plain JAX.
        rows = 0
        rem = n_elems

    tail_sum = jnp.float32(0.0)
    if rem:
        xt = x_flat[rows * _LANES:].astype(jnp.float32)
        yt = y_flat[rows * _LANES:].astype(jnp.float32)
        tail_sum = jnp.sum(_stable_bce(xt, yt))

    main_sum = jnp.float32(0.0)
    if rows:
        if rem:
            # TODO(synk): this prefix slice may materialize a copy of the
            # lane-aligned prefix; the common (n % 128 == 0) path below is a
            # zero-copy bitcast reshape (no host-side pad copy anymore).
            x2 = x_flat[: rows * _LANES].reshape(rows, _LANES)
            y2 = y_flat[: rows * _LANES].reshape(rows, _LANES)
        else:
            x2 = x_flat.reshape(rows, _LANES)
            y2 = y_flat.reshape(rows, _LANES)

        # Large streaming tile (default 4096 rows = 2 MiB f32 / 1 MiB bf16 per
        # input block), clamped to an 8-row-aligned size not exceeding the slab.
        tr = max(_SUBLANES, min(tile_rows, (rows // _SUBLANES) * _SUBLANES))
        row_blocks = pl.cdiv(rows, tr)

        if num_chunks is None:
            num_chunks = _num_chunks_for_device()
        num_chunks = max(1, min(num_chunks, row_blocks))
        blocks_per_chunk = pl.cdiv(row_blocks, num_chunks)
        multi_chunk = num_chunks > 1

        # Only the (rare) partial last block and at most num_chunks-1 clamped
        # duplicate blocks pay any masking cost; interior tiles never do.
        has_partial = (rows % tr != 0) or (num_chunks * blocks_per_chunk != row_blocks)

        if multi_chunk:
            grid = (num_chunks, blocks_per_chunk)

            def in_map(c, i):
                # Clamp so the (at most one) duplicate trailing block never
                # indexes past the last valid block; it is zeroed in-kernel.
                return (jnp.minimum(c * blocks_per_chunk + i, row_blocks - 1), 0)

            out_map = lambda c, i: (c, 0, 0)
            dims = ("parallel", "arbitrary")
        else:
            grid = (row_blocks,)
            in_map = lambda i: (i, 0)
            out_map = lambda i: (0, 0, 0)
            dims = ("arbitrary",)

        kernel = functools.partial(
            _bce_sum_kernel,
            total_rows=rows,
            tile_rows=tr,
            blocks_per_chunk=blocks_per_chunk,
            multi_chunk=multi_chunk,
            has_partial=has_partial,
        )

        partials = pl.pallas_call(
            kernel,
            out_shape=jax.ShapeDtypeStruct((num_chunks, _SUBLANES, _LANES),
                                           jnp.float32),
            grid_spec=pltpu.PrefetchScalarGridSpec(
                num_scalar_prefetch=0,
                grid=grid,
                in_specs=[
                    pl.BlockSpec((tr, _LANES), in_map),
                    pl.BlockSpec((tr, _LANES), in_map),
                ],
                out_specs=pl.BlockSpec((1, _SUBLANES, _LANES), out_map),
                scratch_shapes=[pltpu.VMEM((_SUBLANES, _LANES), jnp.float32)],
            ),
            compiler_params=pltpu.CompilerParams(
                dimension_semantics=dims,
                # Explicit limit: safe on v5e's 16 MiB default scoped VMEM and
                # within v7x's 64 MiB physical; actual use is ~12-16 MiB.
                vmem_limit_bytes=32 * 1024 * 1024,
            ),
        )(x2, y2)
        main_sum = jnp.sum(partials)

    # Tiny scalar focal epilogue (4 scalar ops) in plain JAX.
    mean_bce = (main_sum + tail_sum) / jnp.float32(n_elems)
    logpt = -mean_bce
    pt = jnp.exp(logpt)
    return -((1.0 - pt) ** jnp.float32(gamma)) * logpt


def _ref_focal_loss(x, y, gamma=0.8):
    x = x.astype(jnp.float32)
    y = y.astype(jnp.float32)
    bce = _stable_bce(x, y)
    logpt = -jnp.mean(bce)
    pt = jnp.exp(logpt)
    return -((1.0 - pt) ** gamma) * logpt


if __name__ == "__main__":
    key = jax.random.PRNGKey(0)
    kx, ky = jax.random.split(key)

    # Small NCHW-shaped logits and binary targets (matches the PyTorch module).
    x = jax.random.normal(kx, (2, 4, 16, 16), dtype=jnp.float32)
    y = (jax.random.uniform(ky, (2, 4, 16, 16)) > 0.5).astype(jnp.float32)

    out = focal_loss(x, y, gamma=0.8, reduction="mean")
    out = jax.block_until_ready(out)
    ref = _ref_focal_loss(x, y, gamma=0.8)
    assert jnp.allclose(out, ref, rtol=1e-5, atol=1e-6), (out, ref)

    # (1) size not a multiple of 128 and smaller than one slab
    #     -> pure plain-JAX tail path.
    kx2, ky2 = jax.random.split(jax.random.PRNGKey(1))
    x_odd = jax.random.normal(kx2, (2, 3, 7, 5), dtype=jnp.float32)
    y_odd = (jax.random.uniform(ky2, (2, 3, 7, 5)) > 0.5).astype(jnp.float32)
    out_odd = jax.block_until_ready(focal_loss(x_odd, y_odd, gamma=0.8))
    assert jnp.allclose(out_odd, _ref_focal_loss(x_odd, y_odd, gamma=0.8),
                        rtol=1e-5, atol=1e-6), (out_odd,)

    # (2) lane-aligned prefix + <128-element tail, partial last block in-kernel.
    kx3, ky3 = jax.random.split(jax.random.PRNGKey(2))
    x_pref = jax.random.normal(kx3, (3, 5, 7, 11), dtype=jnp.float32)
    y_pref = (jax.random.uniform(ky3, (3, 5, 7, 11)) > 0.5).astype(jnp.float32)
    out_pref = jax.block_until_ready(focal_loss(x_pref, y_pref, gamma=0.8))
    assert jnp.allclose(out_pref, _ref_focal_loss(x_pref, y_pref, gamma=0.8),
                        rtol=1e-5, atol=1e-6), (out_pref,)

    # (3) rows not a multiple of the tile -> gated partial-block mask branch.
    kx4, ky4 = jax.random.split(jax.random.PRNGKey(3))
    x_part = jax.random.normal(kx4, (2, 4, 36, 36), dtype=jnp.float32)
    y_part = (jax.random.uniform(ky4, (2, 4, 36, 36)) > 0.5).astype(jnp.float32)
    out_part = jax.block_until_ready(focal_loss(x_part, y_part, gamma=0.8))
    assert jnp.allclose(out_part, _ref_focal_loss(x_part, y_part, gamma=0.8),
                        rtol=1e-5, atol=1e-6), (out_part,)

    # (4) forced 2-chunk split with an uneven block count -> exercises the
    #     parallel chunk axis, index clamp and zeroed duplicate block.
    kx5, ky5 = jax.random.split(jax.random.PRNGKey(4))
    x_big = jax.random.normal(kx5, (6, 4, 32, 32), dtype=jnp.float32)
    y_big = (jax.random.uniform(ky5, (6, 4, 32, 32)) > 0.5).astype(jnp.float32)
    out_big = jax.block_until_ready(
        focal_loss(x_big, y_big, gamma=0.8, tile_rows=64, num_chunks=2))
    assert jnp.allclose(out_big, _ref_focal_loss(x_big, y_big, gamma=0.8),
                        rtol=1e-5, atol=1e-6), (out_big,)

    print("KERNEL_OK")
</pallas_src>

<mosaic_0001>
module attributes {stable_mosaic.version = 11 : i64} {
  func.func @_bce_sum_kernel(%arg0: i32, %arg1: memref<16x128xf32, #tpu.memory_space<vmem>>, %arg2: memref<16x128xbf16, #tpu.memory_space<vmem>>, %arg3: memref<1x8x128xf32, #tpu.memory_space<vmem>>, %arg4: memref<8x128xf32, #tpu.memory_space<vmem>>) attributes {dimension_semantics = [#tpu.dimension_semantics<arbitrary>], iteration_bounds = array<i64: 1>, scalar_prefetch = 0 : i64, scratch_operands = 1 : i64, tpu.core_type = #tpu.core_type<tc>, window_params = [{transform_indices = @transform_0, window_bounds = array<i64: 16, 128>}, {transform_indices = @transform_1, window_bounds = array<i64: 16, 128>}, {pipeline_mode = #tpu.pipeline_mode<synchronous>, transform_indices = @transform_2, window_bounds = array<i64: 1, 8, 128>}]} {
    %c0_i32 = arith.constant 0 : i32
    %0 = arith.cmpi eq, %arg0, %c0_i32 : i32
    %1 = arith.extui %0 : i1 to i32
    %c0_i32_0 = arith.constant 0 : i32
    %2 = arith.cmpi ne, %1, %c0_i32_0 : i32
    scf.if %2 {
      %cst_12 = arith.constant 0.000000e+00 : f32
      %24 = vector.broadcast %cst_12 : f32 to vector<8x128xf32>
      %c0_13 = arith.constant 0 : index
      %c0_14 = arith.constant 0 : index
      %25 = vector.load %arg4[%c0_13, %c0_14] : memref<8x128xf32, #tpu.memory_space<vmem>>, vector<8x128xf32>
      tpu.vector_store %arg4[%c0_13, %c0_14], %24 {strides = array<i32>} : memref<8x128xf32, #tpu.memory_space<vmem>>, vector<8x128xf32>,
    } else {
    }
    %c0 = arith.constant 0 : index
    %c0_1 = arith.constant 0 : index
    %3 = vector.load %arg1[%c0, %c0_1] : memref<16x128xf32, #tpu.memory_space<vmem>>, vector<16x128xf32>
    %c0_2 = arith.constant 0 : index
    %c0_3 = arith.constant 0 : index
    %4 = vector.load %arg2[%c0_2, %c0_3] : memref<16x128xbf16, #tpu.memory_space<vmem>>, vector<16x128xbf16>
    %5 = arith.extf %4 : vector<16x128xbf16> to vector<16x128xf32>
    %cst = arith.constant 0.000000e+00 : f32
    %6 = vector.broadcast %cst : f32 to vector<16x128xf32>
    %7 = arith.maximumf %3, %6 : vector<16x128xf32>
    %8 = arith.mulf %3, %5 : vector<16x128xf32>
    %9 = arith.subf %7, %8 : vector<16x128xf32>
    %10 = math.absf %3 : vector<16x128xf32>
    %cst_4 = arith.constant 0.000000e+00 : f32
    %11 = vector.broadcast %cst_4 : f32 to vector<16x128xf32>
    %12 = arith.subf %11, %10 : vector<16x128xf32>
    %13 = math.exp %12 : vector<16x128xf32>
    %14 = math.log1p %13 : vector<16x128xf32>
    %15 = arith.addf %9, %14 : vector<16x128xf32>
    %c0_5 = arith.constant 0 : index
    %c0_6 = arith.constant 0 : index
    %16 = vector.load %arg4[%c0_5, %c0_6] : memref<8x128xf32, #tpu.memory_space<vmem>>, vector<8x128xf32>
    %17 = vector.shape_cast %15 : vector<16x128xf32> to vector<2x8x128xf32>
    %cst_7 = arith.constant dense<0.000000e+00> : vector<8x128xf32>
    %18 = vector.multi_reduction <add>, %17, %cst_7 [0] : vector<2x8x128xf32> to vector<8x128xf32>
    %19 = arith.addf %16, %18 : vector<8x128xf32>
    %c0_8 = arith.constant 0 : index
    %c0_9 = arith.constant 0 : index
    %20 = vector.load %arg4[%c0_8, %c0_9] : memref<8x128xf32, #tpu.memory_space<vmem>>, vector<8x128xf32>
    tpu.vector_store %arg4[%c0_8, %c0_9], %19 {strides = array<i32>} : memref<8x128xf32, #tpu.memory_space<vmem>>, vector<8x128xf32>,
    %c0_i32_10 = arith.constant 0 : i32
    %21 = arith.cmpi eq, %arg0, %c0_i32_10 : i32
    %22 = arith.extui %21 : i1 to i32
    %c0_i32_11 = arith.constant 0 : i32
    %23 = arith.cmpi ne, %22, %c0_i32_11 : i32
    scf.if %23 {
      %c0_12 = arith.constant 0 : index
      %c0_13 = arith.constant 0 : index
      %24 = vector.load %arg4[%c0_12, %c0_13] : memref<8x128xf32, #tpu.memory_space<vmem>>, vector<8x128xf32>
      %25 = vector.shape_cast %24 : vector<8x128xf32> to vector<1x8x128xf32>
      %c0_14 = arith.constant 0 : index
      %c0_15 = arith.constant 0 : index
      %c0_16 = arith.constant 0 : index
      %26 = vector.load %arg3[%c0_14, %c0_15, %c0_16] : memref<1x8x128xf32, #tpu.memory_space<vmem>>, vector<1x8x128xf32>
      tpu.vector_store %arg3[%c0_14, %c0_15, %c0_16], %25 {strides = array<i32>} : memref<1x8x128xf32, #tpu.memory_space<vmem>>, vector<1x8x128xf32>,
    } else {
    }
    return
  }
  func.func @transform_0(%arg0: i32) -> (i32, i32) {
    %c0_i32 = arith.constant 0 : i32
    %c0_i32_0 = arith.constant 0 : i32
    return %arg0, %c0_i32 : i32, i32
  }
  func.func @transform_1(%arg0: i32) -> (i32, i32) {
    %c0_i32 = arith.constant 0 : i32
    %c0_i32_0 = arith.constant 0 : i32
    return %arg0, %c0_i32 : i32, i32
  }
  func.func @transform_2(%arg0: i32) -> (i32, i32, i32) {
    %c0_i32 = arith.constant 0 : i32
    %c0_i32_0 = arith.constant 0 : i32
    %c0_i32_1 = arith.constant 0 : i32
    %c0_i32_2 = arith.constant 0 : i32
    return %c0_i32, %c0_i32_0, %c0_i32_1 : i32, i32, i32
  }
}

</mosaic_0001>

<bundles_post_ra>
// kernel: tpu_custom_call.1
= control target key start
LH: loop header
LB: loop body
LE: loop exit
PB: predicated region body
PF: predicated region fallthrough
CT: control target
= control target key end

     0   :  { %7 = vsyncpa [#allocation4], 0  ;;  %s226_s0 = inlined_call_operand.hbm [shape: f32[16,128], index: 0, kind: input, shape index: {}]   ;;  %s227_s1 = inlined_call_operand.hbm [shape: bf16[16,128], index: 1, kind: input, shape index: {}]   ;;  %s228_s2 = inlined_call_operand.hbm [shape: f32[1,8,128], index: 2, kind: output, shape index: {}]  }
   0x1   :  { %8 = vsyncpa [#allocation7], 0 }
   0x2   :  { %9 = vsyncpa [#allocation5], 0  ;;  %s195_s9 = smov [#allocation3]  }
   0x3   :  { %s15_s10 = sshll.u32 %s195_s9, 4  ;;  %s16_s10 = int_to_ptr.vmem [resolvable:$true] %s15_s10 }
   0x4   :  { %s137_s11 = scalar_lea.vmem %s16_s10, 256  ;;  %p142_p1 = scmp.lt.s32.totalorder %s16_s10, %s16_s10 }
   0x5   :  { %p138_p0 = scmp.ne.s32.totalorder %s16_s10, %s137_s11  ;;  %p143_p2 = scmp.lt.s32.totalorder %s137_s11, %s137_s11 }
   0x7   :  { %p144_p3 = por %p143_p2, %p142_p1 }
   0x9   :  { %p145_p4 = pnand %p144_p3, %p138_p0 }
   0xb   :  { %148 = shalt.err (!%p145_p4)
}
   0xc   :  { %s196_s12 = smov 128   ;;  %s197_s13 = smov 8  }
   0xd   :  { %21 = dma.hbm_to_vmem [thread:$0]  %s226_s0, 256, %s16_s10, [#allocation4], %s196_s12, %s196_s12, %s197_s13  }
   0xe   :  { %s198_s16 = smov [#allocation6]  }
   0xf   :  { %s27_s17 = sshll.u32 %s198_s16, 4  ;;  %s28_s17 = int_to_ptr.vmem [resolvable:$true] %s27_s17 }
  0x10   :  { %s157_s18 = scalar_lea.vmem %s28_s17, 128  ;;  %p162_p6 = scmp.lt.s32.totalorder %s28_s17, %s28_s17 }
  0x11   :  { %p158_p5 = scmp.ne.s32.totalorder %s28_s17, %s157_s18  ;;  %p163_p7 = scmp.lt.s32.totalorder %s157_s18, %s157_s18 }
  0x13   :  { %p164_p8 = por %p163_p7, %p162_p6 }
  0x15   :  { %p165_p9 = pnand %p164_p8, %p158_p5 }
  0x17   :  { %168 = shalt.err (!%p165_p9)
}
  0x18   :  { %s199_s19 = smov 64   ;;  %s200_s20 = smov 4  }
  0x19   :  { %33 = dma.hbm_to_vmem [thread:$0]  %s227_s1, 128, %s28_s17, [#allocation7], %s199_s19, %s199_s19, %s200_s20  }
  0x1a   :  { %189 = dma.done.wait [#allocation4], 256  }
  0x1b   :  { %190 = vsyncadd [#allocation4], 4294967040 }
  0x1c   :  { %191 = dma.done.wait [#allocation7], 128  }
  0x1d   :  { %192 = vsyncadd [#allocation7], 4294967168  ;;  %v45_v0 = vld [vmem:[#allocation3] sm:$0xff]  ;;  %v46_v1 = vld [vmem:[#allocation3 + $0x8] sm:$0xff]  ;;  %s201_s0 = smov [#allocation8]  }
  0x1e   :  { %v57_v2 = vand.u32 2147483647, %v45_v0  ;;  %v58_v3 = vand.u32 2147483647, %v46_v1  ;;  %v111_v12 = vld [vmem:[#allocation6] sm:$0xff]   ;;  %v51_v18 = vmax.f32 %v45_v0, 0.0 }
  0x1f   :  { %v112_v14 = vunpack.c.l.bf16 %v111_v12  ;;  %v113_v16 = vunpack.c.h.bf16 %v111_v12  ;;  %v52_v22 = vmax.f32 %v46_v1, 0.0  ;;  %s100_s1 = sshll.u32 %s201_s0, 4  ;;  %s101_s1 = int_to_ptr.vmem [resolvable:$true] %s100_s1 }
  0x20   :  { %v59_v4 = vsub.f32 0.0, %v57_v2  ;;  %v60_v5 = vsub.f32 0.0, %v58_v3  ;;  %s169_s23 = scalar_lea.vmem %s101_s1, 128  ;;  %p174_p11 = scmp.lt.s32.totalorder %s101_s1, %s101_s1 }
  0x21   :  { %v53_v19 = vmul.f32 %v112_v14, %v45_v0  ;;  %v54_v23 = vmul.f32 %v113_v16, %v46_v1  ;;  %p170_p10 = scmp.ne.s32.totalorder %s101_s1, %s169_s23  ;;  %p175_p12 = scmp.lt.s32.totalorder %s169_s23, %s169_s23 }
  0x22   :  { %v61_v6 = vmul.f32 1.442695, %v59_v4  ;;  %v63_v7 = vmul.f32 1.442695, %v60_v5 }
  0x23   :  { %v55_v27 = vsub.f32 %v51_v18, %v53_v19  ;;  %v56_v30 = vsub.f32 %v52_v22, %v54_v23  ;;  %p176_p13 = por %p175_p12, %p174_p11 }
  0x24   :  { %121 = vpow2.f32 %v61_v6 }
  0x25   :  { %123 = vpow2.f32 %v63_v7  ;;  %p177_p0 = pnand %p176_p13, %p170_p10 }
  0x31   :  { %v122_v8 = vpop.eup %121 }
  0x32   :  { %v124_v9 = vpop.eup %123  ;;  %v65_v10 = vadd.f32 1.0, %v122_v8  ;;  %v68_v13 = vmul.f32 -0.5, %v122_v8  ;;  %v71_v20 = vand.u32 2147483647, %v122_v8 }
  0x33   :  { %v74_v11 = vadd.f32 1.0, %v124_v9  ;;  %v77_v15 = vmul.f32 -0.5, %v124_v9  ;;  %v80_v24 = vand.u32 2147483647, %v124_v9 }
  0x34   :  { %125 = vlog2.f32 %v65_v10  ;;  %v69_v17 = vadd.f32 1.0, %v68_v13  ;;  %vm72_vm0 = vcmp.lt.f32.partialorder %v71_v20, 0.0004427343 }
  0x35   :  { %127 = vlog2.f32 %v74_v11  ;;  %v78_v21 = vadd.f32 1.0, %v77_v15  ;;  %vm81_vm1 = vcmp.lt.f32.partialorder %v80_v24, 0.0004427343 }
  0x36   :  { %v70_v25 = vmul.f32 %v122_v8, %v69_v17 }
  0x37   :  { %v79_v28 = vmul.f32 %v124_v9, %v78_v21 }
  0x41   :  { %v126_v26 = vpop.eup %125 }
  0x42   :  { %v128_v29 = vpop.eup %127  ;;  %v67_v31 = vmul.f32 0.6931472, %v126_v26 }
  0x43   :  { %v76_v32 = vmul.f32 0.6931472, %v128_v29 }
  0x44   :  { %v73_v33 = vsel %vm72_vm0, %v70_v25, %v67_v31 }
  0x45   :  { %v82_v34 = vsel %vm81_vm1, %v79_v28, %v76_v32  ;;  %v83_v35 = vadd.f32 %v73_v33, %v55_v27 }
  0x46   :  { %v84_v36 = vadd.f32 %v82_v34, %v56_v30 }
  0x48   :  { %v86_v37 = vadd.f32 %v84_v36, %v83_v35 }
  0x4a   :  { %93 = vst [vmem:[#allocation8] sm:$0xff] %v86_v37 }
  0x4b   :  { %180 = shalt.err (!%p177_p0)
}
  0x4c   :  { %103 = dma.vmem_to_hbm [thread:$0]  %s101_s1, 128, %s228_s2, [#allocation5]  }
  0x4d   :  { %193 = dma.done.wait [#allocation5], 128  }
  0x4e   :  { %194 = vsyncadd [#allocation5], 4294967168 }
  0x4f   :  { %107 = vsyncpa [#allocation4], 1 }
  0x50   :  { %108 = vsyncpa [#allocation7], 1 }
  0x51   :  { %109 = vsyncpa [#allocation5], 1 }

</bundles_post_ra>
